<compile_context>
chip_gen: v7x
topology: tpu7x:2x2x1
jax: 0.10.0
libtpu: 0.0.40
codegen_flags: <defaults>
</compile_context>

<pallas_src>
import jax
import jax.numpy as jnp
from jax.experimental import pallas as pl
from jax.experimental.pallas import tpu as pltpu

LANES = 128          # lane width of the flattened slab
SUBLANES = 8         # vreg sublane count
SUBLANE_MULT = 16    # row-tile granularity safe for both f32 and bf16 inputs
MAX_TILE_ROWS = 1024 # 1024x128 f32 block = 512 KiB; x2 inputs x2 buffers = 2 MiB VMEM
CHARB_EPS = 1e-6     # eps used by the standard L1_Charbonnier_loss

# Loss spec, mirroring args.loss_name parsing in the PyTorch module.
LOSS_NAME = "1.000_L1+0.500_MSE+0.100_Charbonnier"

_SUPPORTED = ("L1", "MSE", "Charbonnier")


def _parse_loss_name(loss_name):
    """Returns dict loss_type -> weight for the supported loss types."""
    weights = {"L1": 0.0, "MSE": 0.0, "Charbonnier": 0.0}
    for item in loss_name.split("+"):
        w_str, loss_type = item.split("_")
        if loss_type in _SUPPORTED:
            weights[loss_type] += float(w_str)
        # else: VGG / spl / shadow -> see TODO(synk) above
    return weights


def _round_up(x, m):
    return (x + m - 1) // m * m


def _loss_sums_kernel(sr_ref, hr_ref, out_ref):
    """Accumulates per-(sublane, lane) partial sums of |d|, d^2, sqrt(d^2+eps).

    out_ref is a (3, 8, LANES) f32 block resident across the inner grid axis:
      [0] sum |sr - hr|
      [1] sum (sr - hr)^2
      [2] sum sqrt((sr - hr)^2 + eps)
    """
    j = pl.program_id(1)  # inner (reduction) axis

    @pl.when(j == 0)
    def _():
        out_ref[...] = jnp.zeros_like(out_ref)

    diff = sr_ref[...].astype(jnp.float32) - hr_ref[...].astype(jnp.float32)
    sq = diff * diff

    t = diff.shape[0]
    # (T, 128) -> (T//8, 8, 128): layout-preserving reshape, so the axis-0 sum
    # is a chain of whole-vreg VPU adds (no XLU cross-sublane reduction).
    a3 = jnp.abs(diff).reshape(t // SUBLANES, SUBLANES, LANES)
    s3 = sq.reshape(t // SUBLANES, SUBLANES, LANES)

    out_ref[0] += jnp.sum(a3, axis=0)                      # (8, LANES)
    out_ref[1] += jnp.sum(s3, axis=0)                      # (8, LANES)
    out_ref[2] += jnp.sum(jnp.sqrt(s3 + CHARB_EPS), axis=0)  # (8, LANES)


def _prep_operand(x, padded_rows):
    """Flatten to (padded_rows, LANES) in the native dtype (no astype copy)."""
    flat = x.reshape(-1)
    pad = padded_rows * LANES - flat.shape[0]
    if pad:
        # Zero padding of BOTH operands -> diff == 0 for padded elements:
        # contributes 0 to L1/MSE and exactly sqrt(eps) each to Charbonnier
        # (corrected analytically in loss_forward).
        flat = jnp.pad(flat, (0, pad))
    return flat.reshape(padded_rows, LANES)


def loss_forward(sr, hr, loss_name=LOSS_NAME):
    """JAX/Pallas equivalent of Loss.forward(sr, hr) -> scalar loss_sum."""
    assert sr.shape == hr.shape, "sr / hr shape mismatch"
    n_elem = sr.size

    rows_needed = pl.cdiv(n_elem, LANES)
    if rows_needed <= MAX_TILE_ROWS:
        num_splits = 1
        tile_rows = _round_up(rows_needed, SUBLANE_MULT)
    else:
        # Two independent row ranges -> one per TensorCore on v7x megacore.
        num_splits = 2
        tile_rows = min(
            MAX_TILE_ROWS,
            _round_up(pl.cdiv(rows_needed, num_splits), SUBLANE_MULT),
        )
    padded_rows = _round_up(rows_needed, num_splits * tile_rows)
    blocks_per_split = padded_rows // (num_splits * tile_rows)
    pad_elems = padded_rows * LANES - n_elem

    sr2 = _prep_operand(sr, padded_rows)
    hr2 = _prep_operand(hr, padded_rows)

    n_padded = padded_rows * LANES
    bytes_in = (sr2.dtype.itemsize + hr2.dtype.itemsize) * n_padded
    cost = pl.CostEstimate(
        flops=8 * n_padded,
        transcendentals=n_padded,
        bytes_accessed=bytes_in + num_splits * 3 * SUBLANES * LANES * 4,
    )

    def in_map(c, j):
        return (c * blocks_per_split + j, 0)

    sums = pl.pallas_call(
        _loss_sums_kernel,
        out_shape=jax.ShapeDtypeStruct(
            (num_splits, 3, SUBLANES, LANES), jnp.float32
        ),
        grid_spec=pltpu.PrefetchScalarGridSpec(
            num_scalar_prefetch=0,
            grid=(num_splits, blocks_per_split),
            in_specs=[
                pl.BlockSpec((tile_rows, LANES), in_map),
                pl.BlockSpec((tile_rows, LANES), in_map),
            ],
            out_specs=pl.BlockSpec(
                (None, 3, SUBLANES, LANES), lambda c, j: (c, 0, 0, 0)
            ),
        ),
        compiler_params=pltpu.CompilerParams(
            dimension_semantics=("parallel", "arbitrary"),
        ),
        cost_estimate=cost,
    )(sr2, hr2)

    # Final (tiny) cross-core / cross-sublane / cross-lane reduction + weighted
    # combination in plain JAX.
    totals = jnp.sum(sums, axis=(0, 2, 3))  # (3,)
    inv_n = 1.0 / float(n_elem)
    l1_mean = totals[0] * inv_n
    mse_mean = totals[1] * inv_n
    charb_sum = totals[2] - float(pad_elems) * (CHARB_EPS ** 0.5)
    charb_mean = charb_sum * inv_n

    w = _parse_loss_name(loss_name)
    loss_sum = (
        w["L1"] * l1_mean
        + w["MSE"] * mse_mean
        + w["Charbonnier"] * charb_mean
    )
    return loss_sum


def _reference_loss(sr, hr, loss_name=LOSS_NAME):
    """Pure-JAX reference of the same weighted-loss semantics."""
    d = sr.astype(jnp.float32) - hr.astype(jnp.float32)
    w = _parse_loss_name(loss_name)
    return (
        w["L1"] * jnp.mean(jnp.abs(d))
        + w["MSE"] * jnp.mean(d * d)
        + w["Charbonnier"] * jnp.mean(jnp.sqrt(d * d + CHARB_EPS))
    )


if __name__ == "__main__":
    key = jax.random.PRNGKey(0)
    k1, k2, k3, k4 = jax.random.split(key, 4)

    # Small NCHW tensors: batch=2, channels=4, spatial=16x16 (divisible case).
    sr = jax.random.normal(k1, (2, 4, 16, 16), dtype=jnp.float32)
    hr = jax.random.normal(k2, (2, 4, 16, 16), dtype=jnp.float32)

    loss = jax.block_until_ready(loss_forward(sr, hr))
    ref = _reference_loss(sr, hr)
    assert jnp.allclose(loss, ref, rtol=1e-5, atol=1e-6), (loss, ref)

    # Ragged case exercising the zero-pad + Charbonnier correction path.
    sr_r = jax.random.normal(k3, (2, 3, 17, 19), dtype=jnp.float32)
    hr_r = jax.random.normal(k4, (2, 3, 17, 19), dtype=jnp.float32)

    loss_r = jax.block_until_ready(loss_forward(sr_r, hr_r))
    ref_r = _reference_loss(sr_r, hr_r)
    assert jnp.allclose(loss_r, ref_r, rtol=1e-5, atol=1e-6), (loss_r, ref_r)

    print("KERNEL_OK")
</pallas_src>

<mosaic_0001>
module attributes {stable_mosaic.version = 11 : i64} {
  func.func @_loss_sums_kernel(%arg0: i32, %arg1: i32, %arg2: memref<16x128xf32, #tpu.memory_space<vmem>>, %arg3: memref<16x128xf32, #tpu.memory_space<vmem>>, %arg4: memref<1x3x8x128xf32, #tpu.memory_space<vmem>>) attributes {dimension_semantics = [#tpu.dimension_semantics<parallel>, #tpu.dimension_semantics<arbitrary>], iteration_bounds = array<i64: 1, 1>, scalar_prefetch = 0 : i64, scratch_operands = 0 : i64, tpu.core_type = #tpu.core_type<tc>, window_params = [{transform_indices = @transform_0, window_bounds = array<i64: 16, 128>}, {transform_indices = @transform_1, window_bounds = array<i64: 16, 128>}, {transform_indices = @transform_2, window_bounds = array<i64: 1, 3, 8, 128>}]} {
    %c0_i32 = arith.constant 0 : i32
    %0 = arith.cmpi eq, %arg1, %c0_i32 : i32
    %1 = arith.extui %0 : i1 to i32
    %c0_i32_0 = arith.constant 0 : i32
    %2 = arith.cmpi ne, %1, %c0_i32_0 : i32
    scf.if %2 {
      %cst_29 = arith.constant 0.000000e+00 : f32
      %34 = vector.broadcast %cst_29 : f32 to vector<3x8x128xf32>
      %c0_30 = arith.constant 0 : index
      %c0_31 = arith.constant 0 : index
      %c0_32 = arith.constant 0 : index
      %c0_33 = arith.constant 0 : index
      %35 = vector.load %arg4[%c0_30, %c0_31, %c0_32, %c0_33] : memref<1x3x8x128xf32, #tpu.memory_space<vmem>>, vector<1x3x8x128xf32>
      %36 = vector.shape_cast %35 : vector<1x3x8x128xf32> to vector<3x8x128xf32>
      %37 = vector.shape_cast %34 : vector<3x8x128xf32> to vector<1x3x8x128xf32>
      tpu.vector_store %arg4[%c0_30, %c0_31, %c0_32, %c0_33], %37 {strides = array<i32>} : memref<1x3x8x128xf32, #tpu.memory_space<vmem>>, vector<1x3x8x128xf32>,
    } else {
    }
    %c0 = arith.constant 0 : index
    %c0_1 = arith.constant 0 : index
    %3 = vector.load %arg2[%c0, %c0_1] : memref<16x128xf32, #tpu.memory_space<vmem>>, vector<16x128xf32>
    %c0_2 = arith.constant 0 : index
    %c0_3 = arith.constant 0 : index
    %4 = vector.load %arg3[%c0_2, %c0_3] : memref<16x128xf32, #tpu.memory_space<vmem>>, vector<16x128xf32>
    %5 = arith.subf %3, %4 : vector<16x128xf32>
    %6 = arith.mulf %5, %5 : vector<16x128xf32>
    %7 = math.absf %5 : vector<16x128xf32>
    %8 = vector.shape_cast %7 : vector<16x128xf32> to vector<2x8x128xf32>
    %9 = vector.shape_cast %6 : vector<16x128xf32> to vector<2x8x128xf32>
    %c0_4 = arith.constant 0 : index
    %c0_5 = arith.constant 0 : index
    %c0_6 = arith.constant 0 : index
    %c0_7 = arith.constant 0 : index
    %10 = vector.load %arg4[%c0_4, %c0_5, %c0_6, %c0_7] : memref<1x3x8x128xf32, #tpu.memory_space<vmem>>, vector<1x1x8x128xf32>
    %11 = vector.shape_cast %10 : vector<1x1x8x128xf32> to vector<8x128xf32>
    %cst = arith.constant dense<0.000000e+00> : vector<8x128xf32>
    %12 = vector.multi_reduction <add>, %8, %cst [0] : vector<2x8x128xf32> to vector<8x128xf32>
    %13 = arith.addf %11, %12 : vector<8x128xf32>
    %c0_8 = arith.constant 0 : index
    %c0_9 = arith.constant 0 : index
    %c0_10 = arith.constant 0 : index
    %c0_11 = arith.constant 0 : index
    %14 = vector.load %arg4[%c0_8, %c0_9, %c0_10, %c0_11] : memref<1x3x8x128xf32, #tpu.memory_space<vmem>>, vector<1x1x8x128xf32>
    %15 = vector.shape_cast %14 : vector<1x1x8x128xf32> to vector<8x128xf32>
    %16 = vector.shape_cast %13 : vector<8x128xf32> to vector<1x1x8x128xf32>
    tpu.vector_store %arg4[%c0_8, %c0_9, %c0_10, %c0_11], %16 {strides = array<i32>} : memref<1x3x8x128xf32, #tpu.memory_space<vmem>>, vector<1x1x8x128xf32>,
    %c0_12 = arith.constant 0 : index
    %c1 = arith.constant 1 : index
    %c0_13 = arith.constant 0 : index
    %c0_14 = arith.constant 0 : index
    %17 = vector.load %arg4[%c0_12, %c1, %c0_13, %c0_14] : memref<1x3x8x128xf32, #tpu.memory_space<vmem>>, vector<1x1x8x128xf32>
    %18 = vector.shape_cast %17 : vector<1x1x8x128xf32> to vector<8x128xf32>
    %cst_15 = arith.constant dense<0.000000e+00> : vector<8x128xf32>
    %19 = vector.multi_reduction <add>, %9, %cst_15 [0] : vector<2x8x128xf32> to vector<8x128xf32>
    %20 = arith.addf %18, %19 : vector<8x128xf32>
    %c0_16 = arith.constant 0 : index
    %c1_17 = arith.constant 1 : index
    %c0_18 = arith.constant 0 : index
    %c0_19 = arith.constant 0 : index
    %21 = vector.load %arg4[%c0_16, %c1_17, %c0_18, %c0_19] : memref<1x3x8x128xf32, #tpu.memory_space<vmem>>, vector<1x1x8x128xf32>
    %22 = vector.shape_cast %21 : vector<1x1x8x128xf32> to vector<8x128xf32>
    %23 = vector.shape_cast %20 : vector<8x128xf32> to vector<1x1x8x128xf32>
    tpu.vector_store %arg4[%c0_16, %c1_17, %c0_18, %c0_19], %23 {strides = array<i32>} : memref<1x3x8x128xf32, #tpu.memory_space<vmem>>, vector<1x1x8x128xf32>,
    %c0_20 = arith.constant 0 : index
    %c2 = arith.constant 2 : index
    %c0_21 = arith.constant 0 : index
    %c0_22 = arith.constant 0 : index
    %24 = vector.load %arg4[%c0_20, %c2, %c0_21, %c0_22] : memref<1x3x8x128xf32, #tpu.memory_space<vmem>>, vector<1x1x8x128xf32>
    %25 = vector.shape_cast %24 : vector<1x1x8x128xf32> to vector<8x128xf32>
    %cst_23 = arith.constant 9.99999997E-7 : f32
    %26 = vector.broadcast %cst_23 : f32 to vector<2x8x128xf32>
    %27 = arith.addf %9, %26 : vector<2x8x128xf32>
    %28 = math.sqrt %27 : vector<2x8x128xf32>
    %cst_24 = arith.constant dense<0.000000e+00> : vector<8x128xf32>
    %29 = vector.multi_reduction <add>, %28, %cst_24 [0] : vector<2x8x128xf32> to vector<8x128xf32>
    %30 = arith.addf %25, %29 : vector<8x128xf32>
    %c0_25 = arith.constant 0 : index
    %c2_26 = arith.constant 2 : index
    %c0_27 = arith.constant 0 : index
    %c0_28 = arith.constant 0 : index
    %31 = vector.load %arg4[%c0_25, %c2_26, %c0_27, %c0_28] : memref<1x3x8x128xf32, #tpu.memory_space<vmem>>, vector<1x1x8x128xf32>
    %32 = vector.shape_cast %31 : vector<1x1x8x128xf32> to vector<8x128xf32>
    %33 = vector.shape_cast %30 : vector<8x128xf32> to vector<1x1x8x128xf32>
    tpu.vector_store %arg4[%c0_25, %c2_26, %c0_27, %c0_28], %33 {strides = array<i32>} : memref<1x3x8x128xf32, #tpu.memory_space<vmem>>, vector<1x1x8x128xf32>,
    return
  }
  func.func @transform_0(%arg0: i32, %arg1: i32) -> (i32, i32) {
    %c1_i32 = arith.constant 1 : i32
    %0 = arith.muli %arg0, %c1_i32 : i32
    %1 = arith.addi %0, %arg1 : i32
    %c0_i32 = arith.constant 0 : i32
    %c0_i32_0 = arith.constant 0 : i32
    return %1, %c0_i32 : i32, i32
  }
  func.func @transform_1(%arg0: i32, %arg1: i32) -> (i32, i32) {
    %c1_i32 = arith.constant 1 : i32
    %0 = arith.muli %arg0, %c1_i32 : i32
    %1 = arith.addi %0, %arg1 : i32
    %c0_i32 = arith.constant 0 : i32
    %c0_i32_0 = arith.constant 0 : i32
    return %1, %c0_i32 : i32, i32
  }
  func.func @transform_2(%arg0: i32, %arg1: i32) -> (i32, i32, i32, i32) {
    %c0_i32 = arith.constant 0 : i32
    %c0_i32_0 = arith.constant 0 : i32
    %c0_i32_1 = arith.constant 0 : i32
    %c0_i32_2 = arith.constant 0 : i32
    return %arg0, %c0_i32, %c0_i32_0, %c0_i32_1 : i32, i32, i32, i32
  }
}

</mosaic_0001>

<bundles_post_ra>
// kernel: tpu_custom_call.1
= control target key start
LH: loop header
LB: loop body
LE: loop exit
PB: predicated region body
PF: predicated region fallthrough
CT: control target
= control target key end

     0   :  { %7 = vsyncpa [#allocation3], 0  ;;  %s264_s0 = inlined_call_operand.hbm [shape: f32[16,128], index: 0, kind: input, shape index: {}]   ;;  %s265_s1 = inlined_call_operand.hbm [shape: f32[16,128], index: 1, kind: input, shape index: {}]   ;;  %s266_s2 = inlined_call_operand.hbm [shape: f32[1,3,8,128], index: 2, kind: output, shape index: {}]  }
   0x1   :  { %8 = vsyncpa [#allocation6], 0 }
   0x2   :  { %9 = vsyncpa [#allocation4], 0  ;;  %s199_s9 = smov [#allocation2]   ;;  %s127_s13 = scalar_lea.hbm %s264_s0, 256 }
   0x3   :  { %s19_s10 = sshll.u32 %s199_s9, 4  ;;  %p128_p0 = scmp.ne.s32.totalorder %s264_s0, %s127_s13  ;;  %s20_s10 = int_to_ptr.vmem [resolvable:$true] %s19_s10 }
   0x4   :  { %p131_p1 = scmp.lt.u32.totalorder %s127_s13, %s264_s0 }
   0x6   :  { %p133_p2 = pnand %p131_p1, %p128_p0 }
   0x8   :  { %136 = shalt.err (!%p133_p2)
}
   0x9   :  { %s137_s18 = scalar_lea.vmem %s20_s10, 256  ;;  %p142_p4 = scmp.lt.s32.totalorder %s20_s10, %s20_s10 }
   0xa   :  { %p138_p3 = scmp.ne.s32.totalorder %s20_s10, %s137_s18  ;;  %p143_p5 = scmp.lt.s32.totalorder %s137_s18, %s137_s18 }
   0xc   :  { %p144_p6 = por %p143_p5, %p142_p4 }
   0xe   :  { %p145_p7 = pnand %p144_p6, %p138_p3 }
  0x10   :  { %148 = shalt.err (!%p145_p7)
}
  0x11   :  { %s200_s19 = smov 128   ;;  %s201_s20 = smov 8  }
  0x12   :  { %25 = dma.hbm_to_vmem [thread:$0]  %s264_s0, 256, %s20_s10, [#allocation3], %s200_s19, %s200_s19, %s201_s20  }
  0x13   :  { %s202_s23 = smov [#allocation5]   ;;  %s149_s27 = scalar_lea.hbm %s265_s1, 256 }
  0x14   :  { %s35_s24 = sshll.u32 %s202_s23, 4  ;;  %p150_p8 = scmp.ne.s32.totalorder %s265_s1, %s149_s27  ;;  %s36_s24 = int_to_ptr.vmem [resolvable:$true] %s35_s24 }
  0x15   :  { %p153_p9 = scmp.lt.u32.totalorder %s149_s27, %s265_s1 }
  0x17   :  { %p155_p10 = pnand %p153_p9, %p150_p8 }
  0x19   :  { %158 = shalt.err (!%p155_p10)
}
  0x1a   :  { %s159_s4 = scalar_lea.vmem %s36_s24, 256  ;;  %p164_p12 = scmp.lt.s32.totalorder %s36_s24, %s36_s24 }
  0x1b   :  { %p160_p11 = scmp.ne.s32.totalorder %s36_s24, %s159_s4  ;;  %p165_p13 = scmp.lt.s32.totalorder %s159_s4, %s159_s4 }
  0x1d   :  { %p166_p0 = por %p165_p13, %p164_p12 }
  0x1f   :  { %p167_p1 = pnand %p166_p0, %p160_p11 }
  0x21   :  { %170 = shalt.err (!%p167_p1)
}
  0x22   :  { %41 = dma.hbm_to_vmem [thread:$0]  %s265_s1, 256, %s36_s24, [#allocation6], %s200_s19, %s200_s19, %s201_s20  }
  0x23   :  { %193 = dma.done.wait [#allocation3], 256  }
  0x24   :  { %194 = vsyncadd [#allocation3], 4294967040 }
  0x25   :  { %195 = dma.done.wait [#allocation6], 256  }
  0x26   :  { %196 = vsyncadd [#allocation6], 4294967040  ;;  %v59_v0 = vld [vmem:[#allocation2] sm:$0xff]  ;;  %v60_v1 = vld [vmem:[#allocation2 + $0x8] sm:$0xff]  ;;  %s203_s1 = smov [#allocation7]  }
  0x27   :  { %v61_v2 = vld [vmem:[#allocation5] sm:$0xff]  ;;  %v62_v3 = vld [vmem:[#allocation5 + $0x8] sm:$0xff]  ;;  %s104_s6 = sshll.u32 %s203_s1, 4  ;;  %s105_s6 = int_to_ptr.vmem [resolvable:$true] %s104_s6 }
  0x28   :  { %v63_v4 = vsub.f32 %v59_v0, %v61_v2  ;;  %v64_v5 = vsub.f32 %v60_v1, %v62_v3  ;;  %s171_s7 = scalar_lea.vmem %s105_s6, 384  ;;  %p176_p3 = scmp.lt.s32.totalorder %s105_s6, %s105_s6 }
  0x29   :  { %p172_p2 = scmp.ne.s32.totalorder %s105_s6, %s171_s7  ;;  %p177_p4 = scmp.lt.s32.totalorder %s171_s7, %s171_s7 }
  0x2a   :  { %v67_v6 = vand.u32 2147483647, %v63_v4  ;;  %v65_v7 = vmul.f32 %v63_v4, %v63_v4  ;;  %v68_v8 = vand.u32 2147483647, %v64_v5  ;;  %v66_v9 = vmul.f32 %v64_v5, %v64_v5 }
  0x2b   :  { %p178_p5 = por %p177_p4, %p176_p3 }
  0x2c   :  { %v80_v10 = vadd.f32 1e-06, %v65_v7  ;;  %v70_v11 = vadd.f32 %v68_v8, %v67_v6  ;;  %v75_v12 = vadd.f32 %v66_v9, %v65_v7  ;;  %v81_v13 = vadd.f32 1e-06, %v66_v9 }
  0x2d   :  { %p179_p6 = pnand %p178_p5, %p172_p2 }
  0x2e   :  { %123 = vrsqrt.f32 %v80_v10  ;;  %72 = vst [vmem:[#allocation7] sm:$0xff] %v70_v11  ;;  %77 = vst [vmem:[#allocation7 + $0x8] sm:$0xff] %v75_v12  ;;  %vm84_vm0 = vcmp.eq.f32.partialorder %v80_v10, inf  ;;  %v87_v15 = vand.u32 2147483648, %v80_v10  ;;  %vm86_vm1 = vcmp.eq.f32.partialorder %v80_v10, 0.0 }
  0x2f   :  { %125 = vrsqrt.f32 %v81_v13  ;;  %vm91_vm2 = vcmp.eq.f32.partialorder %v81_v13, inf  ;;  %v94_v18 = vand.u32 2147483648, %v81_v13  ;;  %vm93_vm3 = vcmp.eq.f32.partialorder %v81_v13, 0.0 }
  0x38   :  { %v124_v14 = vpop.eup %123 }
  0x39   :  { %v126_v16 = vpop.eup %125  ;;  %v83_v17 = vmul.f32 %v124_v14, %v80_v10 }
  0x3a   :  { %v90_v19 = vmul.f32 %v126_v16, %v81_v13 }
  0x3b   :  { %v85_v20 = vsel %vm84_vm0, %v80_v10, %v83_v17 }
  0x3c   :  { %v88_v21 = vsel %vm86_vm1, %v87_v15, %v85_v20  ;;  %v92_v22 = vsel %vm91_vm2, %v81_v13, %v90_v19 }
  0x3d   :  { %v95_v23 = vsel %vm93_vm3, %v94_v18, %v92_v22 }
  0x3e   :  { %v96_v24 = vadd.f32 %v95_v23, %v88_v21 }
  0x40   :  { %98 = vst [vmem:[#allocation7 + $0x10] sm:$0xff] %v96_v24 }
  0x41   :  { %182 = shalt.err (!%p179_p6)
}
  0x42   :  { %s183_s10 = scalar_lea.hbm %s266_s2, 384 }
  0x43   :  { %p184_p7 = scmp.ne.s32.totalorder %s266_s2, %s183_s10  ;;  %p187_p8 = scmp.lt.u32.totalorder %s183_s10, %s266_s2 }
  0x45   :  { %p189_p9 = pnand %p187_p8, %p184_p7 }
  0x47   :  { %192 = shalt.err (!%p189_p9)
}
  0x48   :  { %110 = dma.vmem_to_hbm [thread:$0]  %s105_s6, 384, %s266_s2, [#allocation4], %s200_s19, %s200_s19, %s201_s20  }
  0x49   :  { %197 = dma.done.wait [#allocation4], 384  }
  0x4a   :  { %198 = vsyncadd [#allocation4], 4294966912 }
  0x4b   :  { %114 = vsyncpa [#allocation3], 1 }
  0x4c   :  { %115 = vsyncpa [#allocation6], 1 }
  0x4d   :  { %116 = vsyncpa [#allocation4], 1 }

</bundles_post_ra>
